<compile_context>
chip_gen: v7x
topology: tpu7x:2x2x1
jax: 0.10.0
libtpu: 0.0.40
codegen_flags: <defaults>
</compile_context>

<pallas_src>
import math

import jax
import jax.numpy as jnp
import numpy as np
from jax.experimental import pallas as pl
from jax.experimental.pallas import tpu as pltpu

NO_CLUSTER = 66
THETA_OUTPUT_DIM = 512


def _round_up(n, m):
    return ((n + m - 1) // m) * m


def _choose_tile_b(b, requested=512):
    """Multiple-of-8 batch tile; prefers >=2 grid steps (v7x megacore) and large tiles."""
    b8 = _round_up(b, 8)
    if b8 <= 8:
        return b8
    half = _round_up((b8 + 1) // 2, 8)
    return min(requested, half)


def timm_head_kernel(act_ref, w1_ref, b1_ref, w2_ref, b2_ref, out_ref):
    # Fused first layer, single MXU pass:
    #   [prob | GAP(x) | 0] @ [w1p ; wp@w1f ; 0] + (bp@w1f + b1)
    h = jnp.dot(act_ref[...], w1_ref[...],
                preferred_element_type=jnp.float32) + b1_ref[...]

    # Exact (erf-based) GELU, matching torch.nn.GELU() default.
    inv_sqrt2 = jnp.float32(1.0 / math.sqrt(2.0))
    g = 0.5 * h * (1.0 + jax.lax.erf(h * inv_sqrt2))

    y = jnp.dot(g.astype(jnp.bfloat16), w2_ref[...],
                preferred_element_type=jnp.float32) + b2_ref[...]
    out_ref[...] = y.astype(out_ref.dtype)


def preprocess_params(params):
    """Host-side exact fold of the linear stand-in + lane-aligned packing + bf16 cast."""
    C = params["wp"].shape[0]
    wp_fused = jnp.dot(params["wp"], params["w1f"])                    # (C, 512)
    b1_fused = jnp.dot(params["bp"], params["w1f"]) + params["b1"]     # (1, 512)

    k_pack = _round_up(NO_CLUSTER + C, 128)                            # lane-aligned K
    w1_packed = jnp.zeros((k_pack, THETA_OUTPUT_DIM), jnp.float32)
    w1_packed = w1_packed.at[:NO_CLUSTER].set(params["w1p"])           # prob rows
    w1_packed = w1_packed.at[NO_CLUSTER:NO_CLUSTER + C].set(wp_fused)  # fused GAP rows
    return {
        "w1_packed": w1_packed.astype(jnp.bfloat16),
        "b1_fused": b1_fused.astype(jnp.float32),
        "w2": params["w2"].astype(jnp.bfloat16),
        "b2": params["b2"].astype(jnp.float32),
    }


def timm_head_forward(x, prob, fused_params, tile_b=512):
    B, C, H, W = x.shape
    D = THETA_OUTPUT_DIM
    k_pack = fused_params["w1_packed"].shape[0]

    # Backbone stand-in GAP in the wrapper; pack [prob | gap] into one lane-dense
    # bf16 activation whose column order matches the packed w1 rows.
    gap = jnp.mean(x.reshape(B, C, H * W), axis=-1)                    # (B, C)
    act = jnp.concatenate([prob, gap], axis=1)                         # (B, 66 + C)

    tb = _choose_tile_b(B, tile_b)
    b_pad = _round_up(B, tb)
    act = jnp.pad(act, ((0, b_pad - B), (0, k_pack - act.shape[1]))
                  ).astype(jnp.bfloat16)                               # (b_pad, k_pack)

    grid = (b_pad // tb,)
    const = lambda i: (0, 0)  # weights / biases stay resident across batch tiles

    out = pl.pallas_call(
        timm_head_kernel,
        out_shape=jax.ShapeDtypeStruct((b_pad, D), jnp.bfloat16),
        grid=grid,
        in_specs=[
            pl.BlockSpec((tb, k_pack), lambda i: (i, 0)),   # packed activations
            pl.BlockSpec((k_pack, D), const),               # packed first-layer weight
            pl.BlockSpec((1, D), const),                    # fused bias 1 (f32)
            pl.BlockSpec((D, D), const),                    # w2
            pl.BlockSpec((1, D), const),                    # b2 (f32)
        ],
        out_specs=pl.BlockSpec((tb, D), lambda i: (i, 0)),  # lane-dense bf16 output
        compiler_params=pltpu.CompilerParams(
            dimension_semantics=("parallel",),
        ),
    )(act, fused_params["w1_packed"], fused_params["b1_fused"],
      fused_params["w2"], fused_params["b2"])

    return out[:B]


def reference_forward(x, prob, params):
    """Pure-JAX f32 reference matching the original (unfused, unpacked) math."""
    B, C, H, W = x.shape
    feat = x.reshape(B, C, H * W).mean(-1) @ params["wp"] + params["bp"]
    w1 = jnp.concatenate([params["w1f"], params["w1p"]], axis=0)
    cat = jnp.concatenate([feat, prob], axis=1)
    h = cat @ w1 + params["b1"]
    g = jax.nn.gelu(h, approximate=False)
    return g @ params["w2"] + params["b2"]


if __name__ == "__main__":
    key = jax.random.PRNGKey(0)
    B, C, H, W = 8, 4, 16, 16
    k = jax.random.split(key, 8)

    x = jax.random.normal(k[0], (B, C, H, W), jnp.float32)
    prob = jax.nn.softmax(
        jax.random.normal(k[1], (B, NO_CLUSTER), jnp.float32), axis=-1)

    # Scales chosen so outputs are O(1) and the tolerance check is meaningful.
    params = {
        "wp":  2.0 * jax.random.normal(k[2], (C, THETA_OUTPUT_DIM), jnp.float32),
        "bp":  0.1 * jnp.ones((1, THETA_OUTPUT_DIM), jnp.float32),
        "w1f": 0.1 * jax.random.normal(k[3], (THETA_OUTPUT_DIM, THETA_OUTPUT_DIM),
                                       jnp.float32),
        "w1p": 0.5 * jax.random.normal(k[4], (NO_CLUSTER, THETA_OUTPUT_DIM),
                                       jnp.float32),
        "b1":  0.05 * jnp.ones((1, THETA_OUTPUT_DIM), jnp.float32),
        "w2":  0.1 * jax.random.normal(k[5], (THETA_OUTPUT_DIM, THETA_OUTPUT_DIM),
                                       jnp.float32),
        "b2":  jnp.zeros((1, THETA_OUTPUT_DIM), jnp.float32),
    }

    fused = preprocess_params(params)
    y = timm_head_forward(x, prob, fused)
    jax.block_until_ready(y)

    y_ref = reference_forward(x, prob, params)
    # bf16 weights + activations on the MXU (f32 accumulation) and bf16 output
    # storage -> loosened tolerance vs the pure-f32 reference.
    np.testing.assert_allclose(np.asarray(y, dtype=np.float32), np.asarray(y_ref),
                               rtol=3e-2, atol=3e-2)
    print("KERNEL_OK")
</pallas_src>

<mosaic_0001>
module attributes {stable_mosaic.version = 11 : i64} {
  func.func @timm_head_kernel(%arg0: i32, %arg1: memref<8x128xbf16, #tpu.memory_space<vmem>>, %arg2: memref<128x512xbf16, #tpu.memory_space<vmem>>, %arg3: memref<1x512xf32, #tpu.memory_space<vmem>>, %arg4: memref<512x512xbf16, #tpu.memory_space<vmem>>, %arg5: memref<1x512xf32, #tpu.memory_space<vmem>>, %arg6: memref<8x512xbf16, #tpu.memory_space<vmem>>) attributes {dimension_semantics = [#tpu.dimension_semantics<parallel>], iteration_bounds = array<i64: 1>, scalar_prefetch = 0 : i64, scratch_operands = 0 : i64, tpu.core_type = #tpu.core_type<tc>, window_params = [{transform_indices = @transform_0, window_bounds = array<i64: 8, 128>}, {pipeline_mode = #tpu.pipeline_mode<synchronous>, transform_indices = @transform_1, window_bounds = array<i64: 128, 512>}, {pipeline_mode = #tpu.pipeline_mode<synchronous>, transform_indices = @transform_2, window_bounds = array<i64: 1, 512>}, {pipeline_mode = #tpu.pipeline_mode<synchronous>, transform_indices = @transform_3, window_bounds = array<i64: 512, 512>}, {pipeline_mode = #tpu.pipeline_mode<synchronous>, transform_indices = @transform_4, window_bounds = array<i64: 1, 512>}, {transform_indices = @transform_5, window_bounds = array<i64: 8, 512>}]} {
    %c0 = arith.constant 0 : index
    %c0_0 = arith.constant 0 : index
    %0 = vector.load %arg1[%c0, %c0_0] : memref<8x128xbf16, #tpu.memory_space<vmem>>, vector<8x128xbf16>
    %c0_1 = arith.constant 0 : index
    %c0_2 = arith.constant 0 : index
    %1 = vector.load %arg2[%c0_1, %c0_2] : memref<128x512xbf16, #tpu.memory_space<vmem>>, vector<128x512xbf16>
    %cst = arith.constant dense<0.000000e+00> : vector<8x512xf32>
    %2 = tpu.matmul %0, %1, %cst {dimension_numbers = #tpu.dot_dimension_numbers<[1], [0], [0], [1], [0, 0, 1, 1], [], []>} : vector<8x128xbf16>, vector<128x512xbf16>, vector<8x512xf32> -> vector<8x512xf32>
    %c0_3 = arith.constant 0 : index
    %c0_4 = arith.constant 0 : index
    %3 = vector.load %arg3[%c0_3, %c0_4] : memref<1x512xf32, #tpu.memory_space<vmem>>, vector<1x512xf32>
    %4 = vector.broadcast %3 : vector<1x512xf32> to vector<8x512xf32>
    %5 = arith.addf %2, %4 : vector<8x512xf32>
    %cst_5 = arith.constant 5.000000e-01 : f32
    %6 = vector.broadcast %cst_5 : f32 to vector<8x512xf32>
    %7 = arith.mulf %6, %5 : vector<8x512xf32>
    %cst_6 = arith.constant 0.707106769 : f32
    %8 = vector.broadcast %cst_6 : f32 to vector<8x512xf32>
    %9 = arith.mulf %5, %8 : vector<8x512xf32>
    %10 = math.erf %9 : vector<8x512xf32>
    %cst_7 = arith.constant 1.000000e+00 : f32
    %11 = vector.broadcast %cst_7 : f32 to vector<8x512xf32>
    %12 = arith.addf %11, %10 : vector<8x512xf32>
    %13 = arith.mulf %7, %12 : vector<8x512xf32>
    %14 = arith.truncf %13 : vector<8x512xf32> to vector<8x512xbf16>
    %c0_8 = arith.constant 0 : index
    %c0_9 = arith.constant 0 : index
    %15 = vector.load %arg4[%c0_8, %c0_9] : memref<512x512xbf16, #tpu.memory_space<vmem>>, vector<512x512xbf16>
    %cst_10 = arith.constant dense<0.000000e+00> : vector<8x512xf32>
    %16 = tpu.matmul %14, %15, %cst_10 {dimension_numbers = #tpu.dot_dimension_numbers<[1], [0], [0], [1], [0, 0, 1, 1], [], []>} : vector<8x512xbf16>, vector<512x512xbf16>, vector<8x512xf32> -> vector<8x512xf32>
    %c0_11 = arith.constant 0 : index
    %c0_12 = arith.constant 0 : index
    %17 = vector.load %arg5[%c0_11, %c0_12] : memref<1x512xf32, #tpu.memory_space<vmem>>, vector<1x512xf32>
    %18 = vector.broadcast %17 : vector<1x512xf32> to vector<8x512xf32>
    %19 = arith.addf %16, %18 : vector<8x512xf32>
    %20 = arith.truncf %19 : vector<8x512xf32> to vector<8x512xbf16>
    %c0_13 = arith.constant 0 : index
    %c0_14 = arith.constant 0 : index
    %21 = vector.load %arg6[%c0_13, %c0_14] : memref<8x512xbf16, #tpu.memory_space<vmem>>, vector<8x512xbf16>
    tpu.vector_store %arg6[%c0_13, %c0_14], %20 {strides = array<i32>} : memref<8x512xbf16, #tpu.memory_space<vmem>>, vector<8x512xbf16>,
    return
  }
  func.func @transform_0(%arg0: i32) -> (i32, i32) {
    %c0_i32 = arith.constant 0 : i32
    %c0_i32_0 = arith.constant 0 : i32
    return %arg0, %c0_i32 : i32, i32
  }
  func.func @transform_1(%arg0: i32) -> (i32, i32) {
    %c0_i32 = arith.constant 0 : i32
    %c0_i32_0 = arith.constant 0 : i32
    %c0_i32_1 = arith.constant 0 : i32
    return %c0_i32, %c0_i32_0 : i32, i32
  }
  func.func @transform_2(%arg0: i32) -> (i32, i32) {
    %c0_i32 = arith.constant 0 : i32
    %c0_i32_0 = arith.constant 0 : i32
    %c0_i32_1 = arith.constant 0 : i32
    return %c0_i32, %c0_i32_0 : i32, i32
  }
  func.func @transform_3(%arg0: i32) -> (i32, i32) {
    %c0_i32 = arith.constant 0 : i32
    %c0_i32_0 = arith.constant 0 : i32
    %c0_i32_1 = arith.constant 0 : i32
    return %c0_i32, %c0_i32_0 : i32, i32
  }
  func.func @transform_4(%arg0: i32) -> (i32, i32) {
    %c0_i32 = arith.constant 0 : i32
    %c0_i32_0 = arith.constant 0 : i32
    %c0_i32_1 = arith.constant 0 : i32
    return %c0_i32, %c0_i32_0 : i32, i32
  }
  func.func @transform_5(%arg0: i32) -> (i32, i32) {
    %c0_i32 = arith.constant 0 : i32
    %c0_i32_0 = arith.constant 0 : i32
    return %arg0, %c0_i32 : i32, i32
  }
}

</mosaic_0001>

<bundles_post_ra>
// kernel: tpu_custom_call.1
= control target key start
LH: loop header
LB: loop body
LE: loop exit
PB: predicated region body
PF: predicated region fallthrough
CT: control target
= control target key end

     0   :  { %10 = vsyncpa [#allocation3], 0  ;;  %s2023_s0 = inlined_call_operand.hbm [shape: bf16[8,128], index: 0, kind: input, shape index: {}]   ;;  %s2024_s1 = inlined_call_operand.hbm [shape: bf16[128,512], index: 1, kind: input, shape index: {}]   ;;  %s2025_s2 = inlined_call_operand.vmem [shape: f32[1,512], index: 2, kind: input, shape index: {}]   ;;  %s2026_s3 = inlined_call_operand.hbm [shape: bf16[512,512], index: 3, kind: input, shape index: {}]   ;;  %s2027_s4 = inlined_call_operand.vmem [shape: f32[1,512], index: 4, kind: input, shape index: {}]   ;;  %s2028_s5 = inlined_call_operand.hbm [shape: bf16[8,512], index: 5, kind: output, shape index: {}]  }
   0x1   :  { %11 = vsyncpa [#allocation6], 0 }
   0x2   :  { %12 = vsyncpa [#allocation4], 0  ;;  %s1895_s18 = smov [#allocation5]   ;;  %s1801_s22 = scalar_lea.hbm %s2024_s1, 4096 }
   0x3   :  { %s28_s19 = sshll.u32 %s1895_s18, 4  ;;  %p1802_p0 = scmp.ne.s32.totalorder %s2024_s1, %s1801_s22  ;;  %s29_s19 = int_to_ptr.vmem [resolvable:$true] %s28_s19 }
   0x4   :  { %p1805_p1 = scmp.lt.u32.totalorder %s1801_s22, %s2024_s1 }
   0x6   :  { %p1807_p2 = pnand %p1805_p1, %p1802_p0 }
   0x8   :  { %1810 = shalt.err (!%p1807_p2)
}
   0x9   :  { %s1811_s27 = scalar_lea.vmem %s29_s19, 4096  ;;  %p1816_p4 = scmp.lt.s32.totalorder %s29_s19, %s29_s19 }
   0xa   :  { %p1812_p3 = scmp.ne.s32.totalorder %s29_s19, %s1811_s27  ;;  %p1817_p5 = scmp.lt.s32.totalorder %s1811_s27, %s1811_s27 }
   0xc   :  { %p1818_p6 = por %p1817_p5, %p1816_p4 }
   0xe   :  { %p1819_p7 = pnand %p1818_p6, %p1812_p3 }
  0x10   :  { %1822 = shalt.err (!%p1819_p7)
}
  0x11   :  { %s1896_s28 = smov 256   ;;  %s1897_s29 = smov 16  }
  0x12   :  { %34 = dma.hbm_to_vmem [thread:$0]  %s2024_s1, 4096, %s29_s19, [#allocation6], %s1896_s28, %s1896_s28, %s1897_s29  }
  0x13   :  { %s1898_s7 = smov [#allocation2]   ;;  %s1899_s9 = smov [#allocation7]  }
  0x14   :  { %s19_s8 = sshll.u32 %s1898_s7, 4  ;;  %s42_s10 = sshll.u32 %s1899_s9, 4  ;;  %s20_s8 = int_to_ptr.vmem [resolvable:$true] %s19_s8  ;;  %s43_s10 = int_to_ptr.vmem [resolvable:$true] %s42_s10 }
  0x15   :  { %s1823_s13 = scalar_lea.hbm %s2023_s0, 64 }
  0x16   :  { %p1824_p8 = scmp.ne.s32.totalorder %s2023_s0, %s1823_s13  ;;  %p1827_p9 = scmp.lt.u32.totalorder %s1823_s13, %s2023_s0 }
  0x18   :  { %p1829_p10 = pnand %p1827_p9, %p1824_p8 }
  0x1a   :  { %1832 = shalt.err (!%p1829_p10)
}
  0x1b   :  { %s1833_s1 = scalar_lea.vmem %s20_s8, 64  ;;  %p1838_p12 = scmp.lt.s32.totalorder %s20_s8, %s20_s8 }
  0x1c   :  { %p1834_p11 = scmp.ne.s32.totalorder %s20_s8, %s1833_s1  ;;  %p1839_p13 = scmp.lt.s32.totalorder %s1833_s1, %s1833_s1 }
  0x1e   :  { %p1840_p0 = por %p1839_p13, %p1838_p12 }
  0x20   :  { %p1841_p1 = pnand %p1840_p0, %p1834_p11 }
  0x22   :  { %1844 = shalt.err (!%p1841_p1)
}
  0x23   :  { %22 = dma.hbm_to_vmem [thread:$0]  %s2023_s0, 64, %s20_s8, [#allocation3]  }
  0x24   :  { %s1845_s22 = scalar_lea.hbm %s2026_s3, 16384 }
  0x25   :  { %p1846_p2 = scmp.ne.s32.totalorder %s2026_s3, %s1845_s22  ;;  %p1849_p3 = scmp.lt.u32.totalorder %s1845_s22, %s2026_s3 }
  0x27   :  { %p1851_p4 = pnand %p1849_p3, %p1846_p2 }
  0x29   :  { %1854 = shalt.err (!%p1851_p4)
}
  0x2a   :  { %s1855_s27 = scalar_lea.vmem %s43_s10, 16384  ;;  %p1860_p6 = scmp.lt.s32.totalorder %s43_s10, %s43_s10 }
  0x2b   :  { %p1856_p5 = scmp.ne.s32.totalorder %s43_s10, %s1855_s27  ;;  %p1861_p7 = scmp.lt.s32.totalorder %s1855_s27, %s1855_s27 }
  0x2d   :  { %p1862_p8 = por %p1861_p7, %p1860_p6 }
  0x2f   :  { %p1863_p9 = pnand %p1862_p8, %p1856_p5 }
  0x31   :  { %1866 = shalt.err (!%p1863_p9)
}
  0x32   :  { %48 = dma.hbm_to_vmem [thread:$0]  %s2026_s3, 16384, %s43_s10, [#allocation6], %s1896_s28, %s1896_s28, %s1897_s29  }
  0x33   :  { %1889 = dma.done.wait [#allocation3], 64  }
  0x34   :  { %1890 = vsyncadd [#allocation3], 4294967232 }
  0x35   :  { %1891 = dma.done.wait [#allocation6], 20480  }
  0x36   :  { %1892 = vsyncadd [#allocation6], 4294946816  ;;  %v1900_v0 = vmov 0   ;;  %v1553_v1 = vld [vmem:[#allocation5 + $0x4] ss:$16 sps:$4 sm:$0xff]   ;;  %s1901_s6 = smov [#allocation8]  }
  0x37   :  { %308 = vmatprep.mubr.bf16.mxu0 %v1900_v0  ;;  %349 = vmatprep.mubr.bf16.mxu1 %v1900_v0  ;;  %v1555_v2 = vld [vmem:[#allocation5] ss:$16 sps:$4 sm:$0xff]   ;;  %v1556_v3 = vld [vmem:[#allocation5 + $0x24] ss:$16 sps:$4 sm:$0xff]   ;;  %v1577_v10 = vld [vmem:[#allocation5 + $0xc] ss:$16 sps:$4 sm:$0xff]  }
  0x38   :  { %276 = vmatprep.subr.bf16.mxu0 %v1553_v1  ;;  %v1558_v4 = vld [vmem:[#allocation5 + $0x20] ss:$16 sps:$4 sm:$0xff]   ;;  %v1559_v5 = vld [vmem:[#allocation5 + $0x44] ss:$16 sps:$4 sm:$0xff]   ;;  %v1579_v11 = vld [vmem:[#allocation5 + $0x8] ss:$16 sps:$4 sm:$0xff]   ;;  %317 = vmatprep.subr.bf16.mxu1 %v1577_v10 }
  0x39   :  { %277 = vmatpush1.bf16.msra.mxu0 %v1555_v2  ;;  %v1561_v6 = vld [vmem:[#allocation5 + $0x40] ss:$16 sps:$4 sm:$0xff]   ;;  %v1562_v7 = vld [vmem:[#allocation5 + $0x64] ss:$16 sps:$4 sm:$0xff]   ;;  %v1580_v12 = vld [vmem:[#allocation5 + $0x2c] ss:$16 sps:$4 sm:$0xff]   ;;  %318 = vmatpush1.bf16.msra.mxu1 %v1579_v11 }
  0x3a   :  { %278 = vmatprep.subr.bf16.mxu0 %v1556_v3  ;;  %v1564_v8 = vld [vmem:[#allocation5 + $0x60] ss:$16 sps:$4 sm:$0xff]   ;;  %v1565_v9 = vld [vmem:[#allocation5 + $0x84] ss:$16 sps:$4 sm:$0xff]   ;;  %v1582_v14 = vld [vmem:[#allocation5 + $0x28] ss:$16 sps:$4 sm:$0xff]   ;;  %319 = vmatprep.subr.bf16.mxu1 %v1580_v12 }
  0x3b   :  { %v1567_v13 = vld [vmem:[#allocation5 + $0x80] ss:$16 sps:$4 sm:$0xff]   ;;  %v1583_v15 = vld [vmem:[#allocation5 + $0x4c] ss:$16 sps:$4 sm:$0xff]   ;;  %v1568_v16 = vld [vmem:[#allocation5 + $0xa4] ss:$16 sps:$4 sm:$0xff]  }
  0x3c   :  { %v1570_v17 = vld [vmem:[#allocation5 + $0xa0] ss:$16 sps:$4 sm:$0xff]   ;;  %v1585_v18 = vld [vmem:[#allocation5 + $0x48] ss:$16 sps:$4 sm:$0xff]   ;;  %v1586_v19 = vld [vmem:[#allocation5 + $0x6c] ss:$16 sps:$4 sm:$0xff]  }
  0x3d   :  { %279 = vmatpush1.bf16.msra.mxu0 %v1558_v4  ;;  %320 = vmatpush1.bf16.msra.mxu1 %v1582_v14  ;;  %v1571_v20 = vld [vmem:[#allocation5 + $0xc4] ss:$16 sps:$4 sm:$0xff]   ;;  %v1573_v21 = vld [vmem:[#allocation5 + $0xc0] ss:$16 sps:$4 sm:$0xff]   ;;  %v1588_v22 = vld [vmem:[#allocation5 + $0x68] ss:$16 sps:$4 sm:$0xff]  }
  0x3e   :  { %280 = vmatprep.subr.bf16.mxu0 %v1559_v5  ;;  %321 = vmatprep.subr.bf16.mxu1 %v1583_v15  ;;  %v1589_v23 = vld [vmem:[#allocation5 + $0x8c] ss:$16 sps:$4 sm:$0xff]   ;;  %v1574_v24 = vld [vmem:[#allocation5 + $0xe4] ss:$16 sps:$4 sm:$0xff]   ;;  %v1576_v25 = vld [vmem:[#allocation5 + $0xe0] ss:$16 sps:$4 sm:$0xff]  }
  0x3f   :  { %v1591_v26 = vld [vmem:[#allocation5 + $0x88] ss:$16 sps:$4 sm:$0xff]   ;;  %v1592_v27 = vld [vmem:[#allocation5 + $0xac] ss:$16 sps:$4 sm:$0xff]   ;;  %v1603_v28 = vld [vmem:[#allocation7 + $0x4] ss:$16 sps:$4 sm:$0xff]  }
  0x40   :  { %v61_v29 = vld [vmem:[#allocation2] sm:$0xf]  ;;  %v1594_v30 = vld [vmem:[#allocation5 + $0xa8] ss:$16 sps:$4 sm:$0xff]   ;;  %v1601_v32 = vld [vmem:[#allocation7] ss:$16 sps:$4 sm:$0xff]  }
  0x41   :  { %281 = vmatpush1.bf16.msra.mxu0 %v1561_v6  ;;  %322 = vmatpush1.bf16.msra.mxu1 %v1585_v18  ;;  %v1595_v31 = vld [vmem:[#allocation5 + $0xcc] ss:$16 sps:$4 sm:$0xff]   ;;  %v1609_v33 = vld [vmem:[#allocation7 + $0x24] ss:$16 sps:$4 sm:$0xff]   ;;  %v1597_v34 = vld [vmem:[#allocation5 + $0xc8] ss:$16 sps:$4 sm:$0xff]  }
  0x42   :  { %282 = vmatprep.subr.bf16.mxu0 %v1562_v7  ;;  %323 = vmatprep.subr.bf16.mxu1 %v1586_v19  ;;  %v1598_v35 = vld [vmem:[#allocation5 + $0xec] ss:$16 sps:$4 sm:$0xff]   ;;  %v1607_v36 = vld [vmem:[#allocation7 + $0x20] ss:$16 sps:$4 sm:$0xff]   ;;  %v1615_v37 = vld [vmem:[#allocation7 + $0x44] ss:$16 sps:$4 sm:$0xff]  }
  0x43   :  { %v1600_v38 = vld [vmem:[#allocation5 + $0xe8] ss:$16 sps:$4 sm:$0xff]   ;;  %v1606_v39 = vld [vmem:[#allocation7 + $0xc] ss:$16 sps:$4 sm:$0xff]   ;;  %v1613_v40 = vld [vmem:[#allocation7 + $0x40] ss:$16 sps:$4 sm:$0xff]  }
  0x44   :  { %v1621_v41 = vld [vmem:[#allocation7 + $0x64] ss:$16 sps:$4 sm:$0xff]   ;;  %v1604_v42 = vld [vmem:[#allocation7 + $0x8] ss:$16 sps:$4 sm:$0xff]   ;;  %v1612_v43 = vld [vmem:[#allocation7 + $0x2c] ss:$16 sps:$4 sm:$0xff]  }
  0x45   :  { %283 = vmatpush1.bf16.msra.mxu0 %v1564_v8  ;;  %324 = vmatpush1.bf16.msra.mxu1 %v1588_v22  ;;  %v1619_v44 = vld [vmem:[#allocation7 + $0x60] ss:$16 sps:$4 sm:$0xff]   ;;  %v1627_v45 = vld [vmem:[#allocation7 + $0x84] ss:$16 sps:$4 sm:$0xff]   ;;  %v1610_v46 = vld [vmem:[#allocation7 + $0x28] ss:$16 sps:$4 sm:$0xff]  }
  0x46   :  { %284 = vmatprep.subr.bf16.mxu0 %v1565_v9  ;;  %325 = vmatprep.subr.bf16.mxu1 %v1589_v23  ;;  %v1618_v47 = vld [vmem:[#allocation7 + $0x4c] ss:$16 sps:$4 sm:$0xff]   ;;  %v1625_v48 = vld [vmem:[#allocation7 + $0x80] ss:$16 sps:$4 sm:$0xff]   ;;  %v1633_v49 = vld [vmem:[#allocation7 + $0xa4] ss:$16 sps:$4 sm:$0xff]  }
  0x47   :  { %v1616_v50 = vld [vmem:[#allocation7 + $0x48] ss:$16 sps:$4 sm:$0xff]   ;;  %v1624_v51 = vld [vmem:[#allocation7 + $0x6c] ss:$16 sps:$4 sm:$0xff]   ;;  %v1631_v52 = vld [vmem:[#allocation7 + $0xa0] ss:$16 sps:$4 sm:$0xff]  }
  0x48   :  { %v1639_v53 = vld [vmem:[#allocation7 + $0xc4] ss:$16 sps:$4 sm:$0xff]   ;;  %v1622_v54 = vld [vmem:[#allocation7 + $0x68] ss:$16 sps:$4 sm:$0xff]   ;;  %v1630_v55 = vld [vmem:[#allocation7 + $0x8c] ss:$16 sps:$4 sm:$0xff]  }
  0x49   :  { %285 = vmatpush1.bf16.msra.mxu0 %v1567_v13  ;;  %326 = vmatpush1.bf16.msra.mxu1 %v1591_v26  ;;  %v1637_v56 = vld [vmem:[#allocation7 + $0xc0] ss:$16 sps:$4 sm:$0xff]   ;;  %v1645_v57 = vld [vmem:[#allocation7 + $0xe4] ss:$16 sps:$4 sm:$0xff]   ;;  %v1628_v58 = vld [vmem:[#allocation7 + $0x88] ss:$16 sps:$4 sm:$0xff]  }
  0x4a   :  { %286 = vmatprep.subr.bf16.mxu0 %v1568_v16  ;;  %327 = vmatprep.subr.bf16.mxu1 %v1592_v27  ;;  %v1636_v59 = vld [vmem:[#allocation7 + $0xac] ss:$16 sps:$4 sm:$0xff]   ;;  %v1643_v60 = vld [vmem:[#allocation7 + $0xe0] ss:$16 sps:$4 sm:$0xff]   ;;  %v1651_v61 = vld [vmem:[#allocation7 + $0x104] ss:$16 sps:$4 sm:$0xff]  }
  0x4b   :  { %v1634_v62 = vld [vmem:[#allocation7 + $0xa8] ss:$16 sps:$4 sm:$0xff]   ;;  %v1642_v63 = vld [vmem:[#allocation7 + $0xcc] ss:$16 sps:$4 sm:$0xff]   ;;  %v1649_v0 = vld [vmem:[#allocation7 + $0x100] ss:$16 sps:$4 sm:$0xff]  }
  0x4c   :  { %v1657_v1 = vld [vmem:[#allocation7 + $0x124] ss:$16 sps:$4 sm:$0xff]   ;;  %v1640_v2 = vld [vmem:[#allocation7 + $0xc8] ss:$16 sps:$4 sm:$0xff]   ;;  %v1648_v3 = vld [vmem:[#allocation7 + $0xec] ss:$16 sps:$4 sm:$0xff]  }
  0x4d   :  { %287 = vmatpush1.bf16.msra.mxu0 %v1570_v17  ;;  %328 = vmatpush1.bf16.msra.mxu1 %v1594_v30  ;;  %v1655_v4 = vld [vmem:[#allocation7 + $0x120] ss:$16 sps:$4 sm:$0xff]   ;;  %v1663_v5 = vld [vmem:[#allocation7 + $0x144] ss:$16 sps:$4 sm:$0xff]   ;;  %v1646_v6 = vld [vmem:[#allocation7 + $0xe8] ss:$16 sps:$4 sm:$0xff]  }
  0x4e   :  { %288 = vmatprep.subr.bf16.mxu0 %v1571_v20  ;;  %329 = vmatprep.subr.bf16.mxu1 %v1595_v31  ;;  %v1654_v7 = vld [vmem:[#allocation7 + $0x10c] ss:$16 sps:$4 sm:$0xff]   ;;  %v1661_v8 = vld [vmem:[#allocation7 + $0x140] ss:$16 sps:$4 sm:$0xff]   ;;  %v1652_v9 = vld [vmem:[#allocation7 + $0x108] ss:$16 sps:$4 sm:$0xff]  }
  0x4f   :  { %v1660_v10 = vld [vmem:[#allocation7 + $0x12c] ss:$16 sps:$4 sm:$0xff]   ;;  %v1658_v11 = vld [vmem:[#allocation7 + $0x128] ss:$16 sps:$4 sm:$0xff]   ;;  %v1669_v14 = vld [vmem:[#allocation7 + $0x164] ss:$16 sps:$4 sm:$0xff]  }
  0x50   :  { %v1666_v12 = vld [vmem:[#allocation7 + $0x14c] ss:$16 sps:$4 sm:$0xff]   ;;  %v1664_v13 = vld [vmem:[#allocation7 + $0x148] ss:$16 sps:$4 sm:$0xff]   ;;  %v1667_v16 = vld [vmem:[#allocation7 + $0x160] ss:$16 sps:$4 sm:$0xff]  }
  0x51   :  { %289 = vmatpush1.bf16.msra.mxu0 %v1573_v21  ;;  %330 = vmatpush1.bf16.msra.mxu1 %v1597_v34  ;;  %v1672_v15 = vld [vmem:[#allocation7 + $0x16c] ss:$16 sps:$4 sm:$0xff]   ;;  %v1670_v17 = vld [vmem:[#allocation7 + $0x168] ss:$16 sps:$4 sm:$0xff]   ;;  %v1675_v18 = vld [vmem:[#allocation7 + $0x184] ss:$16 sps:$4 sm:$0xff]  }
  0x52   :  { %290 = vmatprep.subr.bf16.mxu0 %v1574_v24  ;;  %331 = vmatprep.subr.bf16.mxu1 %v1598_v35  ;;  %v1678_v19 = vld [vmem:[#allocation7 + $0x18c] ss:$16 sps:$4 sm:$0xff]   ;;  %v1673_v20 = vld [vmem:[#allocation7 + $0x180] ss:$16 sps:$4 sm:$0xff]   ;;  %v1676_v21 = vld [vmem:[#allocation7 + $0x188] ss:$16 sps:$4 sm:$0xff]  }
  0x53   :  { %v1681_v22 = vld [vmem:[#allocation7 + $0x1a4] ss:$16 sps:$4 sm:$0xff]   ;;  %v1684_v23 = vld [vmem:[#allocation7 + $0x1ac] ss:$16 sps:$4 sm:$0xff]   ;;  %v1679_v24 = vld [vmem:[#allocation7 + $0x1a0] ss:$16 sps:$4 sm:$0xff]  }
  0x54   :  { %v1687_v26 = vld [vmem:[#allocation7 + $0x1c4] ss:$16 sps:$4 sm:$0xff]   ;;  %v1690_v27 = vld [vmem:[#allocation7 + $0x1cc] ss:$16 sps:$4 sm:$0xff]  }
  0x55   :  { %291 = vmatpush1.bf16.msra.mxu0 %v1576_v25  ;;  %332 = vmatpush1.bf16.msra.mxu1 %v1600_v38  ;;  %v1682_v25 = vld [vmem:[#allocation7 + $0x1a8] ss:$16 sps:$4 sm:$0xff]   ;;  %v1693_v30 = vld [vmem:[#allocation7 + $0x1e4] ss:$16 sps:$4 sm:$0xff]   ;;  %v1696_v31 = vld [vmem:[#allocation7 + $0x1ec] ss:$16 sps:$4 sm:$0xff]  }
  0x56   :  { %1172 = vmatprep.subr.bf16.mxu0 %v1603_v28  ;;  %1254 = vmatprep.subr.bf16.mxu1 %v1606_v39  ;;  %v1685_v28 = vld [vmem:[#allocation7 + $0x1c0] ss:$16 sps:$4 sm:$0xff]   ;;  %v1699_v34 = vld [vmem:[#allocation7 + $0x204] ss:$16 sps:$4 sm:$0xff]   ;;  %v1702_v35 = vld [vmem:[#allocation7 + $0x20c] ss:$16 sps:$4 sm:$0xff]  }
  0x57   :  { %v1980_v39 = vld [vmem:[%s2025_s2] sm:$0xf] }
  0x58   :  { %309 = vmatmul.mubr.bf16.vlgmr.msra.gmra.mrb[0].mxu0 %v61_v29  ;;  %350 = vmatmul.mubr.bf16.vlgmr.msra.gmra.mrb[0].mxu1 %v61_v29  ;;  %v1688_v29 = vld [vmem:[#allocation7 + $0x1c8] ss:$16 sps:$4 sm:$0xff]  }
  0x59   :  { %1173 = vmatpush1.bf16.msra.mxu0 %v1601_v32  ;;  %1255 = vmatpush1.bf16.msra.mxu1 %v1604_v42  ;;  %v1691_v32 = vld [vmem:[#allocation7 + $0x1e0] ss:$16 sps:$4 sm:$0xff]  }
  0x5a   :  { %1174 = vmatprep.subr.bf16.mxu0 %v1609_v33  ;;  %1256 = vmatprep.subr.bf16.mxu1 %v1612_v43  ;;  %v1694_v33 = vld [vmem:[#allocation7 + $0x1e8] ss:$16 sps:$4 sm:$0xff]  }
  0x5d   :  { %1175 = vmatpush1.bf16.msra.mxu0 %v1607_v36  ;;  %1257 = vmatpush1.bf16.msra.mxu1 %v1610_v46  ;;  %v96_v36 = vlaneseq }
  0x5e   :  { %1176 = vmatprep.subr.bf16.mxu0 %v1615_v37  ;;  %1258 = vmatprep.subr.bf16.mxu1 %v1618_v47 }
  0x5f   :  { %v1974_v37 = vshrl.u32 %v96_v36, 7  ;;  %v1741_v36 = vld [vmem:[#allocation7 + $0x2e4] ss:$16 sps:$4 sm:$0xff]  }
  0x61   :  { %1177 = vmatpush1.bf16.msra.mxu0 %v1613_v40  ;;  %1259 = vmatpush1.bf16.msra.mxu1 %v1616_v50  ;;  %v98_v38 = vsub.s32 0, %v1974_v37  ;;  %v102_v40 = vsub.s32 1, %v1974_v37 }
  0x62   :  { %1178 = vmatprep.subr.bf16.mxu0 %v1621_v41  ;;  %1260 = vmatprep.subr.bf16.mxu1 %v1624_v51  ;;  %v110_v51 = vsub.s32 3, %v1974_v37 }
  0x63   :  { %v99_v41 = vrot.slane %v1980_v39, %v98_v38  ;;  %v103_v42 = vrot.slane %v1980_v39, %v102_v40 }
  0x65   :  { %1179 = vmatpush1.bf16.msra.mxu0 %v1619_v44  ;;  %1261 = vmatpush1.bf16.msra.mxu1 %v1622_v54 }
  0x66   :  { %1180 = vmatprep.subr.bf16.mxu0 %v1627_v45  ;;  %1262 = vmatprep.subr.bf16.mxu1 %v1630_v55 }
  0x69   :  { %1181 = vmatpush1.bf16.msra.mxu0 %v1625_v48  ;;  %1263 = vmatpush1.bf16.msra.mxu1 %v1628_v58 }
  0x6a   :  { %1182 = vmatprep.subr.bf16.mxu0 %v1633_v49  ;;  %1264 = vmatprep.subr.bf16.mxu1 %v1636_v59 }
  0x6d   :  { %1183 = vmatpush1.bf16.msra.mxu0 %v1631_v52  ;;  %1265 = vmatpush1.bf16.msra.mxu1 %v1634_v62  ;;  %v111_v52 = vrot.slane %v1980_v39, %v110_v51 }
  0x6e   :  { %1184 = vmatprep.subr.bf16.mxu0 %v1639_v53  ;;  %1266 = vmatprep.subr.bf16.mxu1 %v1642_v63 }
  0x71   :  { %1185 = vmatpush1.bf16.msra.mxu0 %v1637_v56  ;;  %1267 = vmatpush1.bf16.msra.mxu1 %v1640_v2 }
  0x72   :  { %1186 = vmatprep.subr.bf16.mxu0 %v1645_v57  ;;  %1268 = vmatprep.subr.bf16.mxu1 %v1648_v3 }
  0x75   :  { %1187 = vmatpush1.bf16.msra.mxu0 %v1643_v60  ;;  %1269 = vmatpush1.bf16.msra.mxu1 %v1646_v6 }
  0x76   :  { %1188 = vmatprep.subr.bf16.mxu0 %v1651_v61  ;;  %1270 = vmatprep.subr.bf16.mxu1 %v1654_v7  ;;  %v1705_v7 = vld [vmem:[#allocation7 + $0x224] ss:$16 sps:$4 sm:$0xff]  }
  0x79   :  { %1189 = vmatpush1.bf16.msra.mxu0 %v1649_v0  ;;  %1271 = vmatpush1.bf16.msra.mxu1 %v1652_v9  ;;  %v1703_v9 = vld [vmem:[#allocation7 + $0x220] ss:$16 sps:$4 sm:$0xff]  }
  0x7a   :  { %1190 = vmatprep.subr.bf16.mxu0 %v1657_v1  ;;  %1272 = vmatprep.subr.bf16.mxu1 %v1660_v10  ;;  %v1706_v10 = vld [vmem:[#allocation7 + $0x228] ss:$16 sps:$4 sm:$0xff]  }
  0x7d   :  { %1191 = vmatpush1.bf16.msra.mxu0 %v1655_v4  ;;  %1273 = vmatpush1.bf16.msra.mxu1 %v1658_v11  ;;  %v1697_v4 = vld [vmem:[#allocation7 + $0x200] ss:$16 sps:$4 sm:$0xff]   ;;  %v1711_v11 = vld [vmem:[#allocation7 + $0x244] ss:$16 sps:$4 sm:$0xff]  }
  0x7e   :  { %1192 = vmatprep.subr.bf16.mxu0 %v1663_v5  ;;  %1274 = vmatprep.subr.bf16.mxu1 %v1666_v12  ;;  %v1700_v5 = vld [vmem:[#allocation7 + $0x208] ss:$16 sps:$4 sm:$0xff]   ;;  %v1714_v12 = vld [vmem:[#allocation7 + $0x24c] ss:$16 sps:$4 sm:$0xff]  }
  0x81   :  { %1193 = vmatpush1.bf16.msra.mxu0 %v1661_v8  ;;  %1275 = vmatpush1.bf16.msra.mxu1 %v1664_v13  ;;  %v1708_v8 = vld [vmem:[#allocation7 + $0x22c] ss:$16 sps:$4 sm:$0xff]  }
  0x82   :  { %1194 = vmatprep.subr.bf16.mxu0 %v1669_v14  ;;  %1276 = vmatprep.subr.bf16.mxu1 %v1672_v15 }
  0x85   :  { %1195 = vmatpush1.bf16.msra.mxu0 %v1667_v16  ;;  %1277 = vmatpush1.bf16.msra.mxu1 %v1670_v17  ;;  %v1709_v16 = vld [vmem:[#allocation7 + $0x240] ss:$16 sps:$4 sm:$0xff]   ;;  %v1712_v17 = vld [vmem:[#allocation7 + $0x248] ss:$16 sps:$4 sm:$0xff]  }
  0x86   :  { %1196 = vmatprep.subr.bf16.mxu0 %v1675_v18  ;;  %1278 = vmatprep.subr.bf16.mxu1 %v1678_v19  ;;  %v1717_v18 = vld [vmem:[#allocation7 + $0x264] ss:$16 sps:$4 sm:$0xff]   ;;  %v1720_v19 = vld [vmem:[#allocation7 + $0x26c] ss:$16 sps:$4 sm:$0xff]  }
  0x89   :  { %1197 = vmatpush1.bf16.msra.mxu0 %v1673_v20  ;;  %1279 = vmatpush1.bf16.msra.mxu1 %v1676_v21 }
  0x8a   :  { %1198 = vmatprep.subr.bf16.mxu0 %v1681_v22  ;;  %1280 = vmatprep.subr.bf16.mxu1 %v1684_v23  ;;  %v1715_v22 = vld [vmem:[#allocation7 + $0x260] ss:$16 sps:$4 sm:$0xff]   ;;  %v1718_v23 = vld [vmem:[#allocation7 + $0x268] ss:$16 sps:$4 sm:$0xff]  }
  0x8d   :  { %1199 = vmatpush1.bf16.msra.mxu0 %v1679_v24  ;;  %1281 = vmatpush1.bf16.msra.mxu1 %v1682_v25  ;;  %v1723_v24 = vld [vmem:[#allocation7 + $0x284] ss:$16 sps:$4 sm:$0xff]   ;;  %v1726_v25 = vld [vmem:[#allocation7 + $0x28c] ss:$16 sps:$4 sm:$0xff]  }
  0x8e   :  { %1200 = vmatprep.subr.bf16.mxu0 %v1687_v26  ;;  %1282 = vmatprep.subr.bf16.mxu1 %v1690_v27  ;;  %v1721_v26 = vld [vmem:[#allocation7 + $0x280] ss:$16 sps:$4 sm:$0xff]   ;;  %v1724_v27 = vld [vmem:[#allocation7 + $0x288] ss:$16 sps:$4 sm:$0xff]  }
  0x91   :  { %1201 = vmatpush1.bf16.msra.mxu0 %v1685_v28  ;;  %1283 = vmatpush1.bf16.msra.mxu1 %v1688_v29  ;;  %v1729_v28 = vld [vmem:[#allocation7 + $0x2a4] ss:$16 sps:$4 sm:$0xff]   ;;  %v1732_v29 = vld [vmem:[#allocation7 + $0x2ac] ss:$16 sps:$4 sm:$0xff]  }
  0x92   :  { %1202 = vmatprep.subr.bf16.mxu0 %v1693_v30  ;;  %1284 = vmatprep.subr.bf16.mxu1 %v1696_v31  ;;  %v1727_v30 = vld [vmem:[#allocation7 + $0x2a0] ss:$16 sps:$4 sm:$0xff]   ;;  %v1730_v31 = vld [vmem:[#allocation7 + $0x2a8] ss:$16 sps:$4 sm:$0xff]  }
  0x95   :  { %1203 = vmatpush1.bf16.msra.mxu0 %v1691_v32  ;;  %1285 = vmatpush1.bf16.msra.mxu1 %v1694_v33  ;;  %v1735_v32 = vld [vmem:[#allocation7 + $0x2c4] ss:$16 sps:$4 sm:$0xff]   ;;  %v1738_v33 = vld [vmem:[#allocation7 + $0x2cc] ss:$16 sps:$4 sm:$0xff]  }
  0x96   :  { %1213 = vmatprep.subr.bf16.mxu0 %v1699_v34  ;;  %1295 = vmatprep.subr.bf16.mxu1 %v1702_v35  ;;  %v1733_v34 = vld [vmem:[#allocation7 + $0x2c0] ss:$16 sps:$4 sm:$0xff]   ;;  %v1736_v35 = vld [vmem:[#allocation7 + $0x2c8] ss:$16 sps:$4 sm:$0xff]  }
 0x12b   :  { %v310_v43 = vpop.f32.mrb[0].mxu0  ;;  %v1993_v53 = vpop.f32.mrb[0].mxu1 }
 0x12c   :  { %v311_v44 = vadd.f32 %v310_v43, %v99_v41  ;;  %v312_v45 = vpop.f32.mrb[1].mxu0  ;;  %v353_v54 = vpop.f32.mrb[1].mxu1  ;;  %v1744_v41 = vld [vmem:[#allocation7 + $0x2ec] ss:$16 sps:$4 sm:$0xff]   ;;  %v1739_v43 = vld [vmem:[#allocation7 + $0x2e0] ss:$16 sps:$4 sm:$0xff]  }
 0x12d   :  { %v313_v46 = vadd.f32 %v312_v45, %v103_v42  ;;  %v314_v47 = vpop.f32.mrb[2].mxu0  ;;  %v354_v55 = vadd.f32 %v353_v54, %v111_v52  ;;  %v355_v56 = vpop.f32.mrb[2].mxu1  ;;  %v106_v42 = vsub.s32 2, %v1974_v37  ;;  %v1747_v45 = vld [vmem:[#allocation7 + $0x304] ss:$16 sps:$4 sm:$0xff]  }
 0x12e   :  { %v362_v48 = vmul.f32 0.70710677, %v311_v44  ;;  %v315_v49 = vpop.f32.mrb[3].mxu0  ;;  %v356_v57 = vpop.f32.mrb[3].mxu1  ;;  %v358_v61 = vmul.f32 0.5, %v311_v44 }
 0x12f   :  { %v363_v50 = vmul.f32 0.70710677, %v313_v46  ;;  %v365_v59 = vmul.f32 0.70710677, %v354_v55  ;;  %v359_v63 = vmul.f32 0.5, %v313_v46  ;;  %v361_v13 = vmul.f32 0.5, %v354_v55 }
 0x130   :  { %1793 = verf.f32 %v362_v48  ;;  %v1742_v44 = vld [vmem:[#allocation7 + $0x2e8] ss:$16 sps:$4 sm:$0xff]   ;;  %v1750_v46 = vld [vmem:[#allocation7 + $0x30c] ss:$16 sps:$4 sm:$0xff]   ;;  %v107_v47 = vrot.slane %v1980_v39, %v106_v42  ;;  %v1745_v48 = vld [vmem:[#allocation7 + $0x300] ss:$16 sps:$4 sm:$0xff]  }
 0x131   :  { %1795 = verf.f32 %v363_v50  ;;  %v1748_v49 = vld [vmem:[#allocation7 + $0x308] ss:$16 sps:$4 sm:$0xff]   ;;  %v1753_v50 = vld [vmem:[#allocation7 + $0x324] ss:$16 sps:$4 sm:$0xff]   ;;  %v1756_v52 = vld [vmem:[#allocation7 + $0x32c] ss:$16 sps:$4 sm:$0xff]  }
 0x132   :  { %1797 = verf.f32 %v365_v59  ;;  %v352_v54 = vadd.f32 %v1993_v53, %v107_v47  ;;  %v1751_v55 = vld [vmem:[#allocation7 + $0x320] ss:$16 sps:$4 sm:$0xff]   ;;  %v1754_v56 = vld [vmem:[#allocation7 + $0x328] ss:$16 sps:$4 sm:$0xff]   ;;  %v1759_v57 = vld [vmem:[#allocation7 + $0x344] ss:$16 sps:$4 sm:$0xff]  }
 0x133   :  { %v1757_v39 = vld [vmem:[#allocation7 + $0x340] ss:$16 sps:$4 sm:$0xff]  }
 0x134   :  { %v364_v59 = vmul.f32 0.70710677, %v352_v54  ;;  %v1763_v53 = vld [vmem:[#allocation7 + $0x360] ss:$16 sps:$4 sm:$0xff]  }
 0x136   :  { %1799 = verf.f32 %v364_v59 }
 0x13a   :  { %v1794_v58 = vpop.eup %1793 }
 0x13b   :  { %v1796_v60 = vpop.eup %1795  ;;  %v370_v62 = vadd.f32 1.0, %v1794_v58  ;;  %v1762_v58 = vld [vmem:[#allocation7 + $0x34c] ss:$16 sps:$4 sm:$0xff]  }
 0x13c   :  { %v371_v0 = vadd.f32 1.0, %v1796_v60  ;;  %v1798_v14 = vpop.eup %1797  ;;  %v1760_v60 = vld [vmem:[#allocation7 + $0x348] ss:$16 sps:$4 sm:$0xff]  }
 0x13d   :  { %v374_v1 = vmul.f32 %v370_v62, %v358_v61  ;;  %v373_v15 = vadd.f32 1.0, %v1798_v14  ;;  %v1765_v61 = vld [vmem:[#allocation7 + $0x364] ss:$16 sps:$4 sm:$0xff]   ;;  %v1768_v62 = vld [vmem:[#allocation7 + $0x36c] ss:$16 sps:$4 sm:$0xff]  }
 0x13e   :  { %v375_v2 = vmul.f32 %v371_v0, %v359_v63  ;;  %v1766_v63 = vld [vmem:[#allocation7 + $0x368] ss:$16 sps:$4 sm:$0xff]   ;;  %v1771_v0 = vld [vmem:[#allocation7 + $0x384] ss:$16 sps:$4 sm:$0xff]  }
 0x13f   :  { %v378_v6 = vpack.c.bf16 %v374_v1, %v374_v1  ;;  %v377_v20 = vmul.f32 %v373_v15, %v361_v13  ;;  %v1774_v1 = vld [vmem:[#allocation7 + $0x38c] ss:$16 sps:$4 sm:$0xff]   ;;  %v360_v13 = vmul.f32 0.5, %v352_v54  ;;  %v1789_v15 = vld [vmem:[#allocation7 + $0x3e4] ss:$16 sps:$4 sm:$0xff]  }
 0x140   :  { %v379_v3 = vpack.c.bf16 %v375_v2, %v375_v2  ;;  %v1769_v2 = vld [vmem:[#allocation7 + $0x380] ss:$16 sps:$4 sm:$0xff]  }
 0x141   :  { %v381_v21 = vpack.c.bf16 %v377_v20, %v377_v20 }
 0x142   :  { %1204 = vmatprep.mubr.bf16.mxu0 %v379_v3  ;;  %1286 = vmatprep.mubr.bf16.mxu1 %v379_v3  ;;  %v1772_v3 = vld [vmem:[#allocation7 + $0x388] ss:$16 sps:$4 sm:$0xff]  }
 0x143   :  { %1205 = vmatmul.mubr.bf16.vlgmr.msra.gmra.mrb[4].mxu0 %v378_v6  ;;  %1287 = vmatmul.mubr.bf16.vlgmr.msra.gmra.mrb[4].mxu1 %v378_v6  ;;  %v1775_v6 = vld [vmem:[#allocation7 + $0x3a0] ss:$16 sps:$4 sm:$0xff]  }
 0x144   :  { %1214 = vmatpush1.bf16.msra.mxu0 %v1697_v4  ;;  %1296 = vmatpush1.bf16.msra.mxu1 %v1700_v5  ;;  %v1777_v4 = vld [vmem:[#allocation7 + $0x3a4] ss:$16 sps:$4 sm:$0xff]   ;;  %v1780_v5 = vld [vmem:[#allocation7 + $0x3ac] ss:$16 sps:$4 sm:$0xff]  }
 0x145   :  { %1215 = vmatprep.subr.bf16.mxu0 %v1705_v7  ;;  %1297 = vmatprep.subr.bf16.mxu1 %v1708_v8  ;;  %v1778_v7 = vld [vmem:[#allocation7 + $0x3a8] ss:$16 sps:$4 sm:$0xff]   ;;  %v1783_v8 = vld [vmem:[#allocation7 + $0x3c4] ss:$16 sps:$4 sm:$0xff]  }
 0x146   :  { %1245 = vmatprep.mubr.bf16.mxu0 %v381_v21  ;;  %1327 = vmatprep.mubr.bf16.mxu1 %v381_v21  ;;  %v510_v21 = vld [vmem:[%s2027_s4] sm:$0xf]  ;;  %s1360_s4 = sshll.u32 %s1901_s6, 4  ;;  %s1361_s4 = int_to_ptr.vmem [resolvable:$true] %s1360_s4 }
 0x147   :  { %s1867_s7 = scalar_lea.vmem %s1361_s4, 256  ;;  %p1872_p11 = scmp.lt.s32.totalorder %s1361_s4, %s1361_s4 }
 0x148   :  { %1216 = vmatpush1.bf16.msra.mxu0 %v1703_v9  ;;  %1298 = vmatpush1.bf16.msra.mxu1 %v1706_v10  ;;  %v1786_v9 = vld [vmem:[#allocation7 + $0x3cc] ss:$16 sps:$4 sm:$0xff]   ;;  %v1800_v10 = vpop.eup %1799  ;;  %p1868_p10 = scmp.ne.s32.totalorder %s1361_s4, %s1867_s7  ;;  %p1873_p12 = scmp.lt.s32.totalorder %s1867_s7, %s1867_s7 }
 0x149   :  { %1217 = vmatprep.subr.bf16.mxu0 %v1711_v11  ;;  %1299 = vmatprep.subr.bf16.mxu1 %v1714_v12  ;;  %v1781_v11 = vld [vmem:[#allocation7 + $0x3c0] ss:$16 sps:$4 sm:$0xff]   ;;  %v1784_v12 = vld [vmem:[#allocation7 + $0x3c8] ss:$16 sps:$4 sm:$0xff]   ;;  %v372_v14 = vadd.f32 1.0, %v1800_v10 }
 0x14a   :  { %p1874_p13 = por %p1873_p12, %p1872_p11 }
 0x14c   :  { %1218 = vmatpush1.bf16.msra.mxu0 %v1709_v16  ;;  %1300 = vmatpush1.bf16.msra.mxu1 %v1712_v17  ;;  %v1792_v16 = vld [vmem:[#allocation7 + $0x3ec] ss:$16 sps:$4 sm:$0xff]   ;;  %v1787_v17 = vld [vmem:[#allocation7 + $0x3e0] ss:$16 sps:$4 sm:$0xff]   ;;  %p1875_p0 = pnand %p1874_p13, %p1868_p10 }
 0x14d   :  { %1219 = vmatprep.subr.bf16.mxu0 %v1717_v18  ;;  %1301 = vmatprep.subr.bf16.mxu1 %v1720_v19  ;;  %v1790_v18 = vld [vmem:[#allocation7 + $0x3e8] ss:$16 sps:$4 sm:$0xff]   ;;  %v376_v19 = vmul.f32 %v372_v14, %v360_v13 }
 0x14f   :  { %v380_v20 = vpack.c.bf16 %v376_v19, %v376_v19 }
 0x150   :  { %1220 = vmatpush1.bf16.msra.mxu0 %v1715_v22  ;;  %1302 = vmatpush1.bf16.msra.mxu1 %v1718_v23  ;;  %v515_v22 = vrot.slane %v510_v21, %v98_v38  ;;  %v523_v23 = vrot.slane %v510_v21, %v106_v42 }
 0x151   :  { %1221 = vmatprep.subr.bf16.mxu0 %v1723_v24  ;;  %1303 = vmatprep.subr.bf16.mxu1 %v1726_v25  ;;  %v519_v24 = vrot.slane %v510_v21, %v102_v40  ;;  %v527_v25 = vrot.slane %v510_v21, %v110_v51 }
 0x154   :  { %1222 = vmatpush1.bf16.msra.mxu0 %v1721_v26  ;;  %1304 = vmatpush1.bf16.msra.mxu1 %v1724_v27 }
 0x155   :  { %1223 = vmatprep.subr.bf16.mxu0 %v1729_v28  ;;  %1305 = vmatprep.subr.bf16.mxu1 %v1732_v29 }
 0x158   :  { %1224 = vmatpush1.bf16.msra.mxu0 %v1727_v30  ;;  %1306 = vmatpush1.bf16.msra.mxu1 %v1730_v31 }
 0x159   :  { %1225 = vmatprep.subr.bf16.mxu0 %v1735_v32  ;;  %1307 = vmatprep.subr.bf16.mxu1 %v1738_v33 }
 0x15c   :  { %1226 = vmatpush1.bf16.msra.mxu0 %v1733_v34  ;;  %1308 = vmatpush1.bf16.msra.mxu1 %v1736_v35 }
 0x15d   :  { %1227 = vmatprep.subr.bf16.mxu0 %v1741_v36  ;;  %1309 = vmatprep.subr.bf16.mxu1 %v1744_v41 }
 0x160   :  { %1228 = vmatpush1.bf16.msra.mxu0 %v1739_v43  ;;  %1310 = vmatpush1.bf16.msra.mxu1 %v1742_v44 }
 0x161   :  { %1229 = vmatprep.subr.bf16.mxu0 %v1747_v45  ;;  %1311 = vmatprep.subr.bf16.mxu1 %v1750_v46 }
 0x164   :  { %1230 = vmatpush1.bf16.msra.mxu0 %v1745_v48  ;;  %1312 = vmatpush1.bf16.msra.mxu1 %v1748_v49 }
 0x165   :  { %1231 = vmatprep.subr.bf16.mxu0 %v1753_v50  ;;  %1313 = vmatprep.subr.bf16.mxu1 %v1756_v52 }
 0x168   :  { %1232 = vmatpush1.bf16.msra.mxu0 %v1751_v55  ;;  %1314 = vmatpush1.bf16.msra.mxu1 %v1754_v56 }
 0x169   :  { %1233 = vmatprep.subr.bf16.mxu0 %v1759_v57  ;;  %1315 = vmatprep.subr.bf16.mxu1 %v1762_v58 }
 0x16c   :  { %1234 = vmatpush1.bf16.msra.mxu0 %v1757_v39  ;;  %1316 = vmatpush1.bf16.msra.mxu1 %v1760_v60 }
 0x16d   :  { %1235 = vmatprep.subr.bf16.mxu0 %v1765_v61  ;;  %1317 = vmatprep.subr.bf16.mxu1 %v1768_v62 }
 0x170   :  { %1236 = vmatpush1.bf16.msra.mxu0 %v1763_v53  ;;  %1318 = vmatpush1.bf16.msra.mxu1 %v1766_v63 }
 0x171   :  { %1237 = vmatprep.subr.bf16.mxu0 %v1771_v0  ;;  %1319 = vmatprep.subr.bf16.mxu1 %v1774_v1 }
 0x174   :  { %1238 = vmatpush1.bf16.msra.mxu0 %v1769_v2  ;;  %1320 = vmatpush1.bf16.msra.mxu1 %v1772_v3 }
 0x175   :  { %1239 = vmatprep.subr.bf16.mxu0 %v1777_v4  ;;  %1321 = vmatprep.subr.bf16.mxu1 %v1780_v5 }
 0x178   :  { %1240 = vmatpush1.bf16.msra.mxu0 %v1775_v6  ;;  %1322 = vmatpush1.bf16.msra.mxu1 %v1778_v7 }
 0x179   :  { %1241 = vmatprep.subr.bf16.mxu0 %v1783_v8  ;;  %1323 = vmatprep.subr.bf16.mxu1 %v1786_v9 }
 0x17c   :  { %1242 = vmatpush1.bf16.msra.mxu0 %v1781_v11  ;;  %1324 = vmatpush1.bf16.msra.mxu1 %v1784_v12 }
 0x17d   :  { %1243 = vmatprep.subr.bf16.mxu0 %v1789_v15  ;;  %1325 = vmatprep.subr.bf16.mxu1 %v1792_v16 }
 0x180   :  { %1244 = vmatpush1.bf16.msra.mxu0 %v1787_v17  ;;  %1326 = vmatpush1.bf16.msra.mxu1 %v1790_v18 }
 0x183   :  { %1246 = vmatmul.mubr.bf16.vlgmr.msra.gmra.mrb[4].mxu0 %v380_v20  ;;  %1328 = vmatmul.mubr.bf16.vlgmr.msra.gmra.mrb[4].mxu1 %v380_v20 }
 0x256   :  { %v1247_v26 = vpop.f32.mrb[4].mxu0  ;;  %v1329_v27 = vpop.f32.mrb[4].mxu1 }
 0x257   :  { %v1534_v28 = vadd.f32 %v1247_v26, %v515_v22  ;;  %v1536_v29 = vadd.f32 %v1329_v27, %v523_v23  ;;  %v1249_v30 = vpop.f32.mrb[5].mxu0  ;;  %v1331_v31 = vpop.f32.mrb[5].mxu1 }
 0x258   :  { %v1535_v32 = vadd.f32 %v1249_v30, %v519_v24  ;;  %v1537_v33 = vadd.f32 %v1331_v31, %v527_v25  ;;  %v1251_v38 = vpop.f32.mrb[6].mxu0  ;;  %v1333_v34 = vpop.f32.mrb[6].mxu1 }
 0x259   :  { %v1252_v35 = vpop.f32.mrb[7].mxu0  ;;  %v1334_v36 = vpop.f32.mrb[7].mxu1 }
 0x25a   :  { %v1532_v41 = vpack.c.bf16 %v1535_v32, %v1534_v28  ;;  %v1533_v42 = vpack.c.bf16 %v1537_v33, %v1536_v29 }
 0x25c   :  { %1352 = vst [vmem:[#allocation8] sm:$0xff] %v1532_v41  ;;  %1353 = vst [vmem:[#allocation8 + $0x8] sm:$0xff] %v1533_v42 }
 0x25d   :  { %1878 = shalt.err (!%p1875_p0)
}
 0x25e   :  { %s1879_s10 = scalar_lea.hbm %s2028_s5, 256 }
 0x25f   :  { %p1880_p1 = scmp.ne.s32.totalorder %s2028_s5, %s1879_s10  ;;  %p1883_p2 = scmp.lt.u32.totalorder %s1879_s10, %s2028_s5 }
 0x261   :  { %p1885_p3 = pnand %p1883_p2, %p1880_p1 }
 0x263   :  { %1888 = shalt.err (!%p1885_p3)
}
 0x264   :  { %1363 = dma.vmem_to_hbm [thread:$0]  %s1361_s4, 256, %s2028_s5, [#allocation4]  }
 0x265   :  { %1893 = dma.done.wait [#allocation4], 256  }
 0x266   :  { %1894 = vsyncadd [#allocation4], 4294967040 }
 0x267   :  { %1367 = vsyncpa [#allocation3], 1 }
 0x268   :  { %1368 = vsyncpa [#allocation6], 1 }
 0x269   :  { %1369 = vsyncpa [#allocation4], 1 }

</bundles_post_ra>
